<compile_context>
chip_gen: v7x
topology: tpu7x:2x2x1
jax: 0.10.0
libtpu: 0.0.40
codegen_flags: <defaults>
</compile_context>

<pallas_src>
import jax
import jax.numpy as jnp
from jax.experimental import pallas as pl
from jax.experimental.pallas import tpu as pltpu

_LANES = 128
# ~4 MiB per block (see design notes above).
_TARGET_BLOCK_BYTES = 4 * 1024 * 1024


def _binarize_kernel(x_ref, o_ref):
    x = x_ref[...]
    # clamp to [-1, 1]
    x = jnp.clip(x, -1.0, 1.0)
    # rescale to [0, 1]  (x * 0.5 is bit-identical to x / 2.0)
    x = (x + 1.0) * 0.5
    # round to {0, 1}  (round-half-to-even, same as torch.round)
    x = jnp.round(x)
    # rescale back to {-1, +1}
    o_ref[...] = x * 2.0 - 1.0


def torch_binarize(x: jax.Array) -> jax.Array:
    """Elementwise binarization of `x` (any shape, float dtype) to {-1, +1}."""
    orig_shape = x.shape
    orig_dtype = x.dtype
    flat = x.reshape(-1)
    n = flat.shape[0]
    if n == 0:
        return x

    # Pad only the lane dimension to a multiple of 128 (no-op / pure bitcast
    # reshape for typical NCHW shapes).  The ragged ROW count is handled by the
    # cdiv grid + Pallas edge masking, so no further padding copies are needed.
    n_pad = (-n) % _LANES
    if n_pad:
        flat = jnp.pad(flat, (0, n_pad))
    rows = flat.shape[0] // _LANES
    slab = flat.reshape(rows, _LANES)

    itemsize = jnp.dtype(orig_dtype).itemsize
    # Minimum sublane tile: 8 rows for 4-byte, 16 for 2-byte, 32 for 1-byte.
    min_rows = max((8 * 4) // itemsize, 8)
    # Rows per block targeting ~_TARGET_BLOCK_BYTES, rounded to min_rows.
    tile = max(_TARGET_BLOCK_BYTES // (_LANES * itemsize), min_rows)
    tile = (tile // min_rows) * min_rows
    # Never allocate a bigger block than the (rounded-up) array needs.
    rows_rounded = ((rows + min_rows - 1) // min_rows) * min_rows
    tile = min(tile, rows_rounded)

    grid = (pl.cdiv(rows, tile),)
    block_bytes = tile * _LANES * itemsize
    # in + out, double-buffered = 4x block, plus headroom; stays well below
    # v7x's 64 MiB physical VMEM (and v5e/v6e's 128 MiB).
    vmem_limit = int(min(4 * block_bytes + 16 * 1024 * 1024, 48 * 1024 * 1024))

    out = pl.pallas_call(
        _binarize_kernel,
        out_shape=jax.ShapeDtypeStruct((rows, _LANES), orig_dtype),
        grid_spec=pltpu.PrefetchScalarGridSpec(
            num_scalar_prefetch=0,
            grid=grid,
            in_specs=[pl.BlockSpec((tile, _LANES), lambda i: (i, 0))],
            out_specs=pl.BlockSpec((tile, _LANES), lambda i: (i, 0)),
        ),
        compiler_params=pltpu.CompilerParams(
            dimension_semantics=("parallel",),
            vmem_limit_bytes=vmem_limit,
        ),
    )(slab)

    out_flat = out.reshape(-1)
    if n_pad:
        out_flat = out_flat[:n]
    return out_flat.reshape(orig_shape)


# TODO(synk): only the forward pass is implemented; the straight-through
# (identity) backward of Clamp/Round would need a jax.custom_vjp wrapper.


def _reference(x):
    return jnp.round(jnp.clip(x, -1.0, 1.0) * 0.5 + 0.5) * 2.0 - 1.0


if __name__ == "__main__":
    key = jax.random.PRNGKey(0)

    # NCHW input, small shape (element count is a multiple of 128 -> hot path).
    x = jax.random.normal(key, (2, 4, 16, 16), dtype=jnp.float32) * 2.0
    y = jax.block_until_ready(torch_binarize(x))
    ref = _reference(x)
    assert y.shape == x.shape and y.dtype == x.dtype
    assert jnp.all(y == ref), "mismatch vs reference"
    assert jnp.all(jnp.abs(y) == 1.0), "output not in {-1,+1}"

    # Ragged element count (not a multiple of 128) to exercise the lane-pad +
    # masked-edge path.
    x2 = jax.random.normal(jax.random.PRNGKey(1), (3, 5, 7, 9), dtype=jnp.float32) * 2.0
    y2 = jax.block_until_ready(torch_binarize(x2))
    assert jnp.all(y2 == _reference(x2)), "mismatch vs reference (ragged)"
    assert jnp.all(jnp.abs(y2) == 1.0), "output not in {-1,+1} (ragged)"

    # bf16 input to exercise the 2-byte sublane-tile path.
    x3 = (jax.random.normal(jax.random.PRNGKey(2), (2, 4, 16, 16)) * 2.0).astype(jnp.bfloat16)
    y3 = jax.block_until_ready(torch_binarize(x3))
    assert y3.dtype == jnp.bfloat16
    assert jnp.all(y3 == _reference(x3)), "mismatch vs reference (bf16)"

    print("KERNEL_OK")
</pallas_src>

<mosaic_0001>
module attributes {stable_mosaic.version = 11 : i64} {
  func.func @_binarize_kernel(%arg0: i32, %arg1: memref<16x128xf32, #tpu.memory_space<vmem>>, %arg2: memref<16x128xf32, #tpu.memory_space<vmem>>) attributes {dimension_semantics = [#tpu.dimension_semantics<parallel>], iteration_bounds = array<i64: 1>, scalar_prefetch = 0 : i64, scratch_operands = 0 : i64, tpu.core_type = #tpu.core_type<tc>, window_params = [{transform_indices = @transform_0, window_bounds = array<i64: 16, 128>}, {transform_indices = @transform_1, window_bounds = array<i64: 16, 128>}]} {
    %c0 = arith.constant 0 : index
    %c0_0 = arith.constant 0 : index
    %0 = vector.load %arg1[%c0, %c0_0] : memref<16x128xf32, #tpu.memory_space<vmem>>, vector<16x128xf32>
    %cst = arith.constant -1.000000e+00 : f32
    %cst_1 = arith.constant 1.000000e+00 : f32
    %1 = vector.broadcast %cst : f32 to vector<16x128xf32>
    %2 = arith.maximumf %1, %0 : vector<16x128xf32>
    %3 = vector.broadcast %cst_1 : f32 to vector<16x128xf32>
    %4 = arith.minimumf %3, %2 : vector<16x128xf32>
    %cst_2 = arith.constant 1.000000e+00 : f32
    %5 = vector.broadcast %cst_2 : f32 to vector<16x128xf32>
    %6 = arith.addf %4, %5 : vector<16x128xf32>
    %cst_3 = arith.constant 5.000000e-01 : f32
    %7 = vector.broadcast %cst_3 : f32 to vector<16x128xf32>
    %8 = arith.mulf %6, %7 : vector<16x128xf32>
    %9 = math.roundeven %8 : vector<16x128xf32>
    %cst_4 = arith.constant 2.000000e+00 : f32
    %10 = vector.broadcast %cst_4 : f32 to vector<16x128xf32>
    %11 = arith.mulf %9, %10 : vector<16x128xf32>
    %cst_5 = arith.constant 1.000000e+00 : f32
    %12 = vector.broadcast %cst_5 : f32 to vector<16x128xf32>
    %13 = arith.subf %11, %12 : vector<16x128xf32>
    %c0_6 = arith.constant 0 : index
    %c0_7 = arith.constant 0 : index
    %14 = vector.load %arg2[%c0_6, %c0_7] : memref<16x128xf32, #tpu.memory_space<vmem>>, vector<16x128xf32>
    tpu.vector_store %arg2[%c0_6, %c0_7], %13 {strides = array<i32>} : memref<16x128xf32, #tpu.memory_space<vmem>>, vector<16x128xf32>,
    return
  }
  func.func @transform_0(%arg0: i32) -> (i32, i32) {
    %c0_i32 = arith.constant 0 : i32
    %c0_i32_0 = arith.constant 0 : i32
    return %arg0, %c0_i32 : i32, i32
  }
  func.func @transform_1(%arg0: i32) -> (i32, i32) {
    %c0_i32 = arith.constant 0 : i32
    %c0_i32_0 = arith.constant 0 : i32
    return %arg0, %c0_i32 : i32, i32
  }
}

</mosaic_0001>

<bundles_post_ra>
// kernel: tpu_custom_call.1
= control target key start
LH: loop header
LB: loop body
LE: loop exit
PB: predicated region body
PF: predicated region fallthrough
CT: control target
= control target key end

     0   :  { %6 = vsyncpa [#allocation3], 0  ;;  %s160_s0 = inlined_call_operand.hbm [shape: f32[16,128], index: 0, kind: input, shape index: {}]   ;;  %s161_s1 = inlined_call_operand.hbm [shape: f32[16,128], index: 1, kind: output, shape index: {}]  }
   0x1   :  { %7 = vsyncpa [#allocation4], 0  ;;  %s116_s6 = smov [#allocation2]   ;;  %s68_s10 = scalar_lea.hbm %s160_s0, 256 }
   0x2   :  { %s13_s7 = sshll.u32 %s116_s6, 4  ;;  %p69_p0 = scmp.ne.s32.totalorder %s160_s0, %s68_s10  ;;  %s14_s7 = int_to_ptr.vmem [resolvable:$true] %s13_s7 }
   0x3   :  { %p72_p1 = scmp.lt.u32.totalorder %s68_s10, %s160_s0 }
   0x5   :  { %p74_p2 = pnand %p72_p1, %p69_p0 }
   0x7   :  { %77 = shalt.err (!%p74_p2)
}
   0x8   :  { %s78_s15 = scalar_lea.vmem %s14_s7, 256  ;;  %p83_p4 = scmp.lt.s32.totalorder %s14_s7, %s14_s7 }
   0x9   :  { %p79_p3 = scmp.ne.s32.totalorder %s14_s7, %s78_s15  ;;  %p84_p5 = scmp.lt.s32.totalorder %s78_s15, %s78_s15 }
   0xb   :  { %p85_p6 = por %p84_p5, %p83_p4 }
   0xd   :  { %p86_p7 = pnand %p85_p6, %p79_p3 }
   0xf   :  { %89 = shalt.err (!%p86_p7)
}
  0x10   :  { %s117_s16 = smov 128   ;;  %s118_s17 = smov 8  }
  0x11   :  { %19 = dma.hbm_to_vmem [thread:$0]  %s160_s0, 256, %s14_s7, [#allocation3], %s117_s16, %s117_s16, %s118_s17  }
  0x12   :  { %112 = dma.done.wait [#allocation3], 256  }
  0x13   :  { %113 = vsyncadd [#allocation3], 4294967040  ;;  %v23_v0 = vld [vmem:[#allocation2] sm:$0xff]  ;;  %v24_v1 = vld [vmem:[#allocation2 + $0x8] sm:$0xff]  ;;  %s119_s20 = smov [#allocation5]  }
  0x14   :  { %v58_v2 = vclamps-f32 %v23_v0, 1.0  ;;  %v59_v3 = vclamps-f32 %v24_v1, 1.0  ;;  %s46_s21 = sshll.u32 %s119_s20, 4  ;;  %s47_s21 = int_to_ptr.vmem [resolvable:$true] %s46_s21 }
  0x15   :  { %s90_s0 = scalar_lea.vmem %s47_s21, 256  ;;  %p95_p9 = scmp.lt.s32.totalorder %s47_s21, %s47_s21 }
  0x16   :  { %v29_v4 = vadd.f32 1.0, %v58_v2  ;;  %v30_v5 = vadd.f32 1.0, %v59_v3  ;;  %p91_p8 = scmp.ne.s32.totalorder %s47_s21, %s90_s0  ;;  %p96_p10 = scmp.lt.s32.totalorder %s90_s0, %s90_s0 }
  0x18   :  { %v31_v6 = vmul.f32 0.5, %v29_v4  ;;  %v32_v7 = vmul.f32 0.5, %v30_v5  ;;  %p97_p11 = por %p96_p10, %p95_p9 }
  0x1a   :  { %v62_v8 = vround.rtne.f32 %v31_v6  ;;  %v63_v9 = vround.rtne.f32 %v32_v7  ;;  %p98_p12 = pnand %p97_p11, %p91_p8 }
  0x1c   :  { %v35_v10 = vmul.f32 2.0, %v62_v8  ;;  %v36_v11 = vmul.f32 2.0, %v63_v9 }
  0x1e   :  { %v60_v12 = vadd.f32 -1.0, %v35_v10  ;;  %v61_v13 = vadd.f32 -1.0, %v36_v11 }
  0x20   :  { %39 = vst [vmem:[#allocation5] sm:$0xff] %v60_v12  ;;  %40 = vst [vmem:[#allocation5 + $0x8] sm:$0xff] %v61_v13 }
  0x21   :  { %101 = shalt.err (!%p98_p12)
}
  0x22   :  { %s102_s24 = scalar_lea.hbm %s161_s1, 256 }
  0x23   :  { %p103_p13 = scmp.ne.s32.totalorder %s161_s1, %s102_s24  ;;  %p106_p0 = scmp.lt.u32.totalorder %s102_s24, %s161_s1 }
  0x25   :  { %p108_p1 = pnand %p106_p0, %p103_p13 }
  0x27   :  { %111 = shalt.err (!%p108_p1)
}
  0x28   :  { %52 = dma.vmem_to_hbm [thread:$0]  %s47_s21, 256, %s161_s1, [#allocation4], %s117_s16, %s117_s16, %s118_s17  }
  0x29   :  { %114 = dma.done.wait [#allocation4], 256  }
  0x2a   :  { %115 = vsyncadd [#allocation4], 4294967040 }
  0x2b   :  { %56 = vsyncpa [#allocation3], 1 }
  0x2c   :  { %57 = vsyncpa [#allocation4], 1 }

</bundles_post_ra>
